<compile_context>
chip_gen: v5e
topology: v5e:2x2
jax: 0.10.0
libtpu: 0.0.40
codegen_flags: <defaults>
</compile_context>

<pallas_src>
import math
import functools

import jax
import jax.numpy as jnp
from jax.experimental import pallas as pl
from jax.experimental.pallas import tpu as pltpu


def _round_up(x, m):
    return ((x + m - 1) // m) * m


def _spatial_encoder_kernel(cxyz_ref, kpt_ref, out_ref, *, sp_level, scale, sigma):
    """One (batch, N-tile) block.

    cxyz_ref: (3, TN)            f32  -- x/y/z rows, N-tile on lanes
    kpt_ref : (K, 3)             f32
    out_ref : ((1+2L)*K, TN)     out dtype
    """
    K = kpt_ref.shape[0]
    c = cxyz_ref[...]                       # (3, TN)
    kpt = kpt_ref[...]                      # (K, 3)
    odt = out_ref.dtype

    # Per-coordinate differences, (1, TN) - (K, 1) -> (K, TN). One broadcast
    # per coordinate, computed once and reused (dz also feeds the embedding).
    dx = c[0:1, :] - kpt[:, 0:1]
    dy = c[1:2, :] - kpt[:, 1:2]
    dz = c[2:3, :] - kpt[:, 2:3]

    # Gaussian decay weight; denominator folded into a constant multiply.
    neg_inv_two_sigma_sq = -1.0 / (2.0 * float(sigma) * float(sigma))
    w = jnp.exp((dx * dx + dy * dy + dz * dz) * neg_inv_two_sigma_sq)  # (K, TN)

    # Group ordering matches torch: [dz, sin_l0, cos_l0, sin_l1, cos_l1, ...].
    # Each group is written directly to its sublane slice (no concatenate).
    out_ref[0:K, :] = (dz * w).astype(odt)

    if sp_level > 0:
        theta = dz * (float(scale) * math.pi)
        s = jnp.sin(theta)                  # single EUP sin
        co = jnp.cos(theta)                 # single EUP cos
        out_ref[K:2 * K, :] = (s * w).astype(odt)
        out_ref[2 * K:3 * K, :] = (co * w).astype(odt)
        for l in range(1, sp_level):
            # Double-angle recurrence on the VPU: angle_l = 2^l * angle_0.
            s, co = 2.0 * s * co, 2.0 * co * co - 1.0
            base = (1 + 2 * l) * K
            out_ref[base:base + K, :] = (s * w).astype(odt)
            out_ref[base + K:base + 2 * K, :] = (co * w).astype(odt)


def spatial_encoder(cxyz, kptxyz, *, sp_level=3, scale=1.0, sigma=0.1,
                    tile_n=1024, out_dtype=jnp.float32):
    """cxyz: [B, N, 3], kptxyz: [B, K, 3] -> [B, (1+2*sp_level)*K, N]."""
    B, N, _ = cxyz.shape
    K = kptxyz.shape[1]
    n_groups = 1 + 2 * sp_level

    # --- choose an N-tile: as large as reasonable, lane-aligned, and with
    # enough grid steps to feed both v7x TensorCores / the DMA pipeline.
    tile_n = min(int(tile_n), _round_up(N, 128))
    tile_n = max(128, _round_up(tile_n, 128))
    while tile_n > 128 and B * pl.cdiv(N, tile_n) < 4:
        tile_n = max(128, _round_up(tile_n // 2, 128))
    Np = _round_up(N, tile_n)

    # glue: channels-first so N lands on the lane axis inside the kernel
    cxyz_t = jnp.transpose(cxyz, (0, 2, 1)).astype(jnp.float32)   # [B, 3, N]
    if Np != N:
        cxyz_t = jnp.pad(cxyz_t, ((0, 0), (0, 0), (0, Np - N)))   # [B, 3, Np]
    kptxyz = kptxyz.astype(jnp.float32)                           # [B, K, 3]

    # --- conservative VMEM budget (double-buffered in/out blocks, 2x margin),
    # clamped to [32 MiB, 64 MiB] so it is valid on v5e/v6e/v7x alike.
    out_itemsize = jnp.dtype(out_dtype).itemsize
    block_bytes = (8 * tile_n * 4
                   + _round_up(K, 8) * 128 * 4
                   + n_groups * K * tile_n * out_itemsize)
    vmem_limit = min(64 << 20, max(4 * block_bytes, 32 << 20))

    kernel = functools.partial(
        _spatial_encoder_kernel, sp_level=sp_level, scale=scale, sigma=sigma)

    out = pl.pallas_call(
        kernel,
        out_shape=jax.ShapeDtypeStruct((B, n_groups * K, Np), out_dtype),
        grid=(B, Np // tile_n),
        in_specs=[
            pl.BlockSpec((None, 3, tile_n), lambda b, i: (b, 0, i)),
            pl.BlockSpec((None, K, 3), lambda b, i: (b, 0, 0)),
        ],
        out_specs=pl.BlockSpec((None, n_groups * K, tile_n),
                               lambda b, i: (b, 0, i)),
        compiler_params=pltpu.CompilerParams(
            dimension_semantics=("parallel", "parallel"),
            vmem_limit_bytes=vmem_limit),
    )(cxyz_t, kptxyz)

    if Np != N:
        out = out[:, :, :N]
    return out


def spatial_encoder_reference(cxyz, kptxyz, *, sp_level=3, scale=1.0, sigma=0.1):
    """Pure-JAX transcription of the PyTorch forward, for validation."""
    B, N, _ = cxyz.shape
    K = kptxyz.shape[1]
    dz = cxyz[:, :, None, 2:3] - kptxyz[:, None, :, 2:3]            # (B,N,K,1)
    dxyz = cxyz[:, :, None] - kptxyz[:, None, :]                    # (B,N,K,3)
    weight = jnp.exp(-jnp.sum(dxyz ** 2, -1) / (2.0 * sigma ** 2))  # (B,N,K)
    x = dz.reshape(B, N, K)
    vec = jnp.asarray([scale * math.pi * (2 ** l) for l in range(sp_level)],
                      dtype=jnp.float32)                            # (L,)
    y = x[:, :, None, :] * vec[None, None, :, None]                 # (B,N,L,K)
    z = jnp.concatenate([jnp.sin(y), jnp.cos(y)], axis=-1).reshape(B, N, -1)
    out = jnp.concatenate([x, z], -1)                               # (B,N,(1+2L)K)
    out = (out.reshape(B, N, -1, K) * weight[:, :, None]).reshape(B, N, -1)
    return jnp.transpose(out, (0, 2, 1))                            # (B,(1+2L)K,N)


def _check(cxyz, kptxyz, sp_level=3, scale=1.0, sigma=0.1):
    out = jax.block_until_ready(
        spatial_encoder(cxyz, kptxyz, sp_level=sp_level, scale=scale, sigma=sigma))
    ref = jax.block_until_ready(
        spatial_encoder_reference(cxyz, kptxyz, sp_level=sp_level, scale=scale,
                                  sigma=sigma))
    B, N, _ = cxyz.shape
    K = kptxyz.shape[1]
    assert out.shape == (B, (1 + 2 * sp_level) * K, N), out.shape
    # atol slightly relaxed vs 1e-5: the double-angle recurrence accumulates a
    # few extra ulps at the highest frequency compared with direct sin/cos.
    assert jnp.allclose(out, ref, rtol=1e-5, atol=2e-5), float(
        jnp.max(jnp.abs(out - ref)))


if __name__ == "__main__":
    # SpatialEncoder has no learnable parameters; defaults: sp_level=3,
    # sp_type='rel_z_decay', scale=1.0, sigma=0.1 (n_kpt=24 for humans).
    key = jax.random.PRNGKey(0)
    k1, k2, k3, k4 = jax.random.split(key, 4)

    # Primary small check: B=2, N=256, K=8 (lane-aligned N path).
    cxyz = jax.random.normal(k1, (2, 256, 3), dtype=jnp.float32)
    kptxyz = jax.random.normal(k2, (2, 8, 3), dtype=jnp.float32)
    _check(cxyz, kptxyz)

    # Second check: non-128-multiple N (exercises the pad + slice path) and
    # the module's default keypoint count K=24.
    cxyz2 = jax.random.normal(k3, (2, 200, 3), dtype=jnp.float32)
    kptxyz2 = jax.random.normal(k4, (2, 24, 3), dtype=jnp.float32)
    _check(cxyz2, kptxyz2)

    print("KERNEL_OK")
</pallas_src>

<mosaic_0001>
module attributes {stable_mosaic.version = 11 : i64} {
  func.func @_spatial_encoder_kernel(%arg0: i32, %arg1: i32, %arg2: memref<1x3x128xf32, #tpu.memory_space<vmem>>, %arg3: memref<1x8x3xf32, #tpu.memory_space<vmem>>, %arg4: memref<1x56x128xf32, #tpu.memory_space<vmem>>) attributes {dimension_semantics = [#tpu.dimension_semantics<parallel>, #tpu.dimension_semantics<parallel>], iteration_bounds = array<i64: 2, 2>, scalar_prefetch = 0 : i64, scratch_operands = 0 : i64, tpu.core_type = #tpu.core_type<tc>, window_params = [{transform_indices = @transform_0, window_bounds = array<i64: 1, 3, 128>}, {transform_indices = @transform_1, window_bounds = array<i64: 1, 8, 3>}, {transform_indices = @transform_2, window_bounds = array<i64: 1, 56, 128>}]} {
    %c0 = arith.constant 0 : index
    %c0_0 = arith.constant 0 : index
    %c0_1 = arith.constant 0 : index
    %0 = vector.load %arg2[%c0, %c0_0, %c0_1] : memref<1x3x128xf32, #tpu.memory_space<vmem>>, vector<1x3x128xf32>
    %1 = vector.shape_cast %0 : vector<1x3x128xf32> to vector<3x128xf32>
    %c0_2 = arith.constant 0 : index
    %c0_3 = arith.constant 0 : index
    %c0_4 = arith.constant 0 : index
    %2 = vector.load %arg3[%c0_2, %c0_3, %c0_4] : memref<1x8x3xf32, #tpu.memory_space<vmem>>, vector<1x8x3xf32>
    %3 = vector.shape_cast %2 : vector<1x8x3xf32> to vector<8x3xf32>
    %4 = vector.extract_strided_slice %1 {offsets = [0, 0], sizes = [1, 128], strides = [1, 1]} : vector<3x128xf32> to vector<1x128xf32>
    %5 = vector.extract_strided_slice %3 {offsets = [0, 0], sizes = [8, 1], strides = [1, 1]} : vector<8x3xf32> to vector<8x1xf32>
    %6 = vector.broadcast %4 : vector<1x128xf32> to vector<8x128xf32>
    %7 = vector.broadcast %5 : vector<8x1xf32> to vector<8x128xf32>
    %8 = arith.subf %6, %7 : vector<8x128xf32>
    %9 = vector.extract_strided_slice %1 {offsets = [1, 0], sizes = [1, 128], strides = [1, 1]} : vector<3x128xf32> to vector<1x128xf32>
    %10 = vector.extract_strided_slice %3 {offsets = [0, 1], sizes = [8, 1], strides = [1, 1]} : vector<8x3xf32> to vector<8x1xf32>
    %11 = vector.broadcast %9 : vector<1x128xf32> to vector<8x128xf32>
    %12 = vector.broadcast %10 : vector<8x1xf32> to vector<8x128xf32>
    %13 = arith.subf %11, %12 : vector<8x128xf32>
    %14 = vector.extract_strided_slice %1 {offsets = [2, 0], sizes = [1, 128], strides = [1, 1]} : vector<3x128xf32> to vector<1x128xf32>
    %15 = vector.extract_strided_slice %3 {offsets = [0, 2], sizes = [8, 1], strides = [1, 1]} : vector<8x3xf32> to vector<8x1xf32>
    %16 = vector.broadcast %14 : vector<1x128xf32> to vector<8x128xf32>
    %17 = vector.broadcast %15 : vector<8x1xf32> to vector<8x128xf32>
    %18 = arith.subf %16, %17 : vector<8x128xf32>
    %19 = arith.mulf %8, %8 : vector<8x128xf32>
    %20 = arith.mulf %13, %13 : vector<8x128xf32>
    %21 = arith.addf %19, %20 : vector<8x128xf32>
    %22 = arith.mulf %18, %18 : vector<8x128xf32>
    %23 = arith.addf %21, %22 : vector<8x128xf32>
    %cst = arith.constant -5.000000e+01 : f32
    %24 = vector.broadcast %cst : f32 to vector<8x128xf32>
    %25 = arith.mulf %23, %24 : vector<8x128xf32>
    %26 = math.exp %25 : vector<8x128xf32>
    %27 = arith.mulf %18, %26 : vector<8x128xf32>
    %c0_5 = arith.constant 0 : index
    %c0_6 = arith.constant 0 : index
    %c0_7 = arith.constant 0 : index
    %28 = vector.load %arg4[%c0_5, %c0_6, %c0_7] : memref<1x56x128xf32, #tpu.memory_space<vmem>>, vector<1x8x128xf32>
    %29 = vector.shape_cast %28 : vector<1x8x128xf32> to vector<8x128xf32>
    %30 = vector.shape_cast %27 : vector<8x128xf32> to vector<1x8x128xf32>
    tpu.vector_store %arg4[%c0_5, %c0_6, %c0_7], %30 {strides = array<i32>} : memref<1x56x128xf32, #tpu.memory_space<vmem>>, vector<1x8x128xf32>,
    %cst_8 = arith.constant 3.14159274 : f32
    %31 = vector.broadcast %cst_8 : f32 to vector<8x128xf32>
    %32 = arith.mulf %18, %31 : vector<8x128xf32>
    %33 = math.sin %32 : vector<8x128xf32>
    %34 = math.cos %32 : vector<8x128xf32>
    %35 = arith.mulf %33, %26 : vector<8x128xf32>
    %c0_9 = arith.constant 0 : index
    %c8 = arith.constant 8 : index
    %c0_10 = arith.constant 0 : index
    %36 = vector.load %arg4[%c0_9, %c8, %c0_10] : memref<1x56x128xf32, #tpu.memory_space<vmem>>, vector<1x8x128xf32>
    %37 = vector.shape_cast %36 : vector<1x8x128xf32> to vector<8x128xf32>
    %38 = vector.shape_cast %35 : vector<8x128xf32> to vector<1x8x128xf32>
    tpu.vector_store %arg4[%c0_9, %c8, %c0_10], %38 {strides = array<i32>} : memref<1x56x128xf32, #tpu.memory_space<vmem>>, vector<1x8x128xf32>,
    %39 = arith.mulf %34, %26 : vector<8x128xf32>
    %c0_11 = arith.constant 0 : index
    %c16 = arith.constant 16 : index
    %c0_12 = arith.constant 0 : index
    %40 = vector.load %arg4[%c0_11, %c16, %c0_12] : memref<1x56x128xf32, #tpu.memory_space<vmem>>, vector<1x8x128xf32>
    %41 = vector.shape_cast %40 : vector<1x8x128xf32> to vector<8x128xf32>
    %42 = vector.shape_cast %39 : vector<8x128xf32> to vector<1x8x128xf32>
    tpu.vector_store %arg4[%c0_11, %c16, %c0_12], %42 {strides = array<i32>} : memref<1x56x128xf32, #tpu.memory_space<vmem>>, vector<1x8x128xf32>,
    %cst_13 = arith.constant 2.000000e+00 : f32
    %43 = vector.broadcast %cst_13 : f32 to vector<8x128xf32>
    %44 = arith.mulf %43, %33 : vector<8x128xf32>
    %45 = arith.mulf %44, %34 : vector<8x128xf32>
    %cst_14 = arith.constant 2.000000e+00 : f32
    %46 = vector.broadcast %cst_14 : f32 to vector<8x128xf32>
    %47 = arith.mulf %46, %34 : vector<8x128xf32>
    %48 = arith.mulf %47, %34 : vector<8x128xf32>
    %cst_15 = arith.constant 1.000000e+00 : f32
    %49 = vector.broadcast %cst_15 : f32 to vector<8x128xf32>
    %50 = arith.subf %48, %49 : vector<8x128xf32>
    %51 = arith.mulf %45, %26 : vector<8x128xf32>
    %c0_16 = arith.constant 0 : index
    %c24 = arith.constant 24 : index
    %c0_17 = arith.constant 0 : index
    %52 = vector.load %arg4[%c0_16, %c24, %c0_17] : memref<1x56x128xf32, #tpu.memory_space<vmem>>, vector<1x8x128xf32>
    %53 = vector.shape_cast %52 : vector<1x8x128xf32> to vector<8x128xf32>
    %54 = vector.shape_cast %51 : vector<8x128xf32> to vector<1x8x128xf32>
    tpu.vector_store %arg4[%c0_16, %c24, %c0_17], %54 {strides = array<i32>} : memref<1x56x128xf32, #tpu.memory_space<vmem>>, vector<1x8x128xf32>,
    %55 = arith.mulf %50, %26 : vector<8x128xf32>
    %c0_18 = arith.constant 0 : index
    %c32 = arith.constant 32 : index
    %c0_19 = arith.constant 0 : index
    %56 = vector.load %arg4[%c0_18, %c32, %c0_19] : memref<1x56x128xf32, #tpu.memory_space<vmem>>, vector<1x8x128xf32>
    %57 = vector.shape_cast %56 : vector<1x8x128xf32> to vector<8x128xf32>
    %58 = vector.shape_cast %55 : vector<8x128xf32> to vector<1x8x128xf32>
    tpu.vector_store %arg4[%c0_18, %c32, %c0_19], %58 {strides = array<i32>} : memref<1x56x128xf32, #tpu.memory_space<vmem>>, vector<1x8x128xf32>,
    %cst_20 = arith.constant 2.000000e+00 : f32
    %59 = vector.broadcast %cst_20 : f32 to vector<8x128xf32>
    %60 = arith.mulf %59, %45 : vector<8x128xf32>
    %61 = arith.mulf %60, %50 : vector<8x128xf32>
    %cst_21 = arith.constant 2.000000e+00 : f32
    %62 = vector.broadcast %cst_21 : f32 to vector<8x128xf32>
    %63 = arith.mulf %62, %50 : vector<8x128xf32>
    %64 = arith.mulf %63, %50 : vector<8x128xf32>
    %cst_22 = arith.constant 1.000000e+00 : f32
    %65 = vector.broadcast %cst_22 : f32 to vector<8x128xf32>
    %66 = arith.subf %64, %65 : vector<8x128xf32>
    %67 = arith.mulf %61, %26 : vector<8x128xf32>
    %c0_23 = arith.constant 0 : index
    %c40 = arith.constant 40 : index
    %c0_24 = arith.constant 0 : index
    %68 = vector.load %arg4[%c0_23, %c40, %c0_24] : memref<1x56x128xf32, #tpu.memory_space<vmem>>, vector<1x8x128xf32>
    %69 = vector.shape_cast %68 : vector<1x8x128xf32> to vector<8x128xf32>
    %70 = vector.shape_cast %67 : vector<8x128xf32> to vector<1x8x128xf32>
    tpu.vector_store %arg4[%c0_23, %c40, %c0_24], %70 {strides = array<i32>} : memref<1x56x128xf32, #tpu.memory_space<vmem>>, vector<1x8x128xf32>,
    %71 = arith.mulf %66, %26 : vector<8x128xf32>
    %c0_25 = arith.constant 0 : index
    %c48 = arith.constant 48 : index
    %c0_26 = arith.constant 0 : index
    %72 = vector.load %arg4[%c0_25, %c48, %c0_26] : memref<1x56x128xf32, #tpu.memory_space<vmem>>, vector<1x8x128xf32>
    %73 = vector.shape_cast %72 : vector<1x8x128xf32> to vector<8x128xf32>
    %74 = vector.shape_cast %71 : vector<8x128xf32> to vector<1x8x128xf32>
    tpu.vector_store %arg4[%c0_25, %c48, %c0_26], %74 {strides = array<i32>} : memref<1x56x128xf32, #tpu.memory_space<vmem>>, vector<1x8x128xf32>,
    return
  }
  func.func @transform_0(%arg0: i32, %arg1: i32) -> (i32, i32, i32) {
    %c0_i32 = arith.constant 0 : i32
    %c0_i32_0 = arith.constant 0 : i32
    return %arg0, %c0_i32, %arg1 : i32, i32, i32
  }
  func.func @transform_1(%arg0: i32, %arg1: i32) -> (i32, i32, i32) {
    %c0_i32 = arith.constant 0 : i32
    %c0_i32_0 = arith.constant 0 : i32
    %c0_i32_1 = arith.constant 0 : i32
    return %arg0, %c0_i32, %c0_i32_0 : i32, i32, i32
  }
  func.func @transform_2(%arg0: i32, %arg1: i32) -> (i32, i32, i32) {
    %c0_i32 = arith.constant 0 : i32
    %c0_i32_0 = arith.constant 0 : i32
    return %arg0, %c0_i32, %arg1 : i32, i32, i32
  }
}

</mosaic_0001>

<bundles_post_ra>
// kernel: tpu_custom_call.1
= control target key start
LH: loop header
LB: loop body
LE: loop exit
PB: predicated region body
PF: predicated region fallthrough
CT: control target
= control target key end

     0   :  { %7 = vsyncpa [#allocation3], 0  ;;  %s1114_s0 = inlined_call_operand.vmem [shape: f32[2,3,256], index: 0, kind: input, shape index: {}]   ;;  %s1115_s1 = inlined_call_operand.vmem [shape: f32[2,8,3], index: 1, kind: input, shape index: {}]   ;;  %s1116_s2 = inlined_call_operand.hbm [shape: f32[2,56,256], index: 2, kind: output, shape index: {}]  }
   0x1   :  { %9 = vsyncpa [#allocation3 + $0x1], 0  ;;  %s890_s9 = smov 0   ;;  %s892_s10 = smov 0  }
   0x2   :  { %s894_s11 = smov 0   ;;  %s896_s12 = smov 0  }
   0x3   :  { %s898_s13 = smov 0   ;;  %s900_s14 = smov 0  }
   0x4   :  { %s902_s15 = smov 0   ;;  %s904_s16 = smov 0  }
   0x5 LB: > { %s657_s17 = sadd.s32 4294967295, %s861_s16   ;;  %s658_s18 = sadd.s32 4294967294, %s861_s16   ;;  %s861_s16 = sphi %s904_s16, %s15_s16   ;;  %s857_s15 = sphi %s902_s15, %s1125_s15   ;;  %s853_s14 = sphi %s900_s14, %s1124_s14   ;;  %s849_s13 = sphi %s898_s13, %s1123_s13   ;;  %s845_s12 = sphi %s896_s12, %s1122_s12   ;;  %s841_s11 = sphi %s894_s11, %s1121_s11   ;;  %s837_s10 = sphi %s892_s10, %s1120_s10   ;;  %s833_s9 = sphi %s890_s9, %s1119_s9  }
   0x6   : > { %s24_s19 = sadd.s32 1, %s853_s14  ;;  %s27_s20 = sadd.s32 1, %s857_s15 }
   0x7   : > { %p25_p0 = scmp.ge.s32.totalorder %s24_s19, 2  ;;  %p100_p1 = scmp.ne.s32.totalorder %s841_s11, %s837_s10 }
   0x8   : > { %p101_p2 = scmp.eq.s32.totalorder %s657_s17, 3  ;;  %p106_p5 = scmp.ne.s32.totalorder %s837_s10, %s833_s9 }
   0x9   : > { %s1127_s19 = smov (%p25_p0, %s24_s19), 0  ;;  %s1129_s20 = smov (!%p25_p0, %s27_s20), %s857_s15 }
   0xa   : > { %s86_s21 = ssub.s32 %s853_s14, %s1127_s19  ;;  %p941_p3 = por %p101_p2, %p100_p1 }
   0xb   : > { %p29_p4 = scmp.ge.s32.totalorder %s1129_s20, 2  ;;  %p107_p6 = scmp.eq.s32.totalorder %s658_s18, 3 }
   0xc   : > { %p661_p7 = scmp.ge.s32.totalorder %s861_s16, 1  ;;  %p143_p9 = scmp.lt.s32.totalorder %s861_s16, 5 }
   0xd   : > { %s1131_s20 = smov (%p29_p4, %s1129_s20), 0  ;;  %p950_p8 = por %p107_p6, %p106_p5 }
   0xe   : > { %s85_s24 = ssub.s32 %s857_s15, %s1131_s20  ;;  %s90_s25 = sadd.s32 1, %s841_s11 }
   0xf   : > { %s87_s26 = sor.u32 %s86_s21, %s85_s24  ;;  %p144_p10 = pnand %p661_p7, %p143_p9 }
  0x10   : > { %p88_p11 = scmp.eq.s32.totalorder %s87_s26, 0  ;;  %p172_p12 = scmp.lt.s32.totalorder (!%p144_p10), %s849_s13, 1 }
  0x11   : > { %147 = sbr.rel (%p144_p10) target bundleno = 261 (0x105), region = 28  ;;  %p174_p13 = scmp.lt.s32.totalorder (!%p144_p10), %s845_s12, 1 }
  0x12   : > { %s959_s27 = scalar_select %p88_p11, %s841_s11, %s90_s25  }
  0x13   : > { %s169_s24 = sand.u32 (!%p144_p10), 1, %s837_s10  }
  0x14   : > { %s676_s25 = smul.u32 (!%p144_p10), 56, %s169_s24 }
  0x16   : > { %v863_v0 = vmov 2   ;;  %v864_v1 = vmov 1   ;;  %s173_s28 = scalar_select %p172_p12, %s849_s13, 1  ;;  %v865_v3 = vmov 0   ;;  %v866_v31 = vmov 683565275  }
  0x17   : > { %761 = vset.pattern.permute.xlu0 %v863_v0  ;;  %763 = vset.pattern.permute.xlu1 %v864_v1  ;;  %s175_s5 = scalar_select %p174_p13, %s845_s12, 1  ;;  %v867_v33 = vmov 2475754826   ;;  %v868_v37 = vmov 2131351028  }
  0x18   : > { %s664_s29 = sshll.u32 %s173_s28, 3  ;;  %s662_s6 = sshll.u32 %s173_s28, 1  ;;  %v869_v40 = vmov 2102212464   ;;  %v870_v43 = vmov 920167782  }
  0x19   : > { %s183_s4 = scalar_lea.vmem %s1115_s1, %s664_s29  ;;  %s177_s7 = sadd.s32 %s662_s6, %s175_s5  ;;  %v871_v46 = vmov 1326507024  }
  0x1a   : > { %v185_v2 = vld [vmem:[%s183_s4] sm:$0xff]  ;;  %s663_s8 = sshll.u32 %s177_s7, 2  ;;  %s1033_s26 = scalar_lea.vmem [#allocation2], %s676_s25 }
  0x1b   : > { %201 = vperm.xlu0 %761, %v185_v2   ;;  %195 = vperm.xlu1 %763, %v185_v2   ;;  %s179_s21 = scalar_lea.vmem %s1114_s0, %s663_s8  ;;  %s677_s28 = smul.u32 14, %s849_s13 }
  0x1c   : > { %v184_v4 = vld [vmem:[%s179_s21] sm:$0x7]  ;;  %s561_s4 = sshll.u32 %s1033_s26, 4  ;;  %s548_s6 = scalar_lea.sflag [#allocation3], %s169_s24  ;;  %s562_s4 = int_to_ptr.vmem [resolvable:$true] %s561_s4 }
  0x1d   : > { %v199_v5 = vperm.slane %v184_v4, 2  ;;  %v193_v8 = vperm.slane %v184_v4, 1  ;;  %v186_v14 = vperm.slane %v184_v4, 0  ;;  %s558_s29 = sadd.s32 %s845_s12, %s677_s28  ;;  %s787_s21 = scalar_lea.hbm %s1116_s2, 224 }
  0x1e   : > { %s673_s13 = sshll.u32 %s558_s29, 3 }
  0x1f   : > { %s560_s3 = scalar_lea.hbm %s1116_s2, %s673_s13 }
  0x20   : > { %s563_s5 = sshll.u32 %s560_s3, 4  ;;  %s564_s5 = int_to_ptr.hbm [resolvable:$true] %s563_s5 }
  0x21   : > { %s781_s7 = sshra.s32 %s564_s5, 4  ;;  %s782_s7 = int_to_ptr.hbm [resolvable:$true] %s781_s7 }
  0x22   : > { %s783_s8 = scalar_lea.hbm %s782_s7, 56  ;;  %p788_p4 = scmp.lt.s32.totalorder %s782_s7, %s1116_s2 }
  0x23   : > { %762 = vset.pattern.permute.xlu0 %v865_v3  ;;  %p784_p0 = scmp.ne.s32.totalorder %s782_s7, %s783_s8  ;;  %p789_p5 = scmp.lt.s32.totalorder %s787_s21, %s783_s8 }
  0x24   : > { %189 = vperm.xlu0 %762, %v185_v2  }
  0x25   : > { %p785_p1 = pnand %p784_p0, %p941_p3  ;;  %p790_p6 = por %p789_p5, %p788_p4 }
  0x27   : > { %p786_p2 = pneg %p785_p1 }
  0x29   : > { %p791_p7 = pnand %p790_p6, %p786_p2 }
  0x2c   : > { %764 = vset.pattern.permute.xlu0 %v863_v0 }
  0x8d   : > { %v202_v6 = vpop.permute.xlu0 %201  ;;  %v196_v10 = vpop.permute.xlu1 %195 }
  0x8e   : > { %v972_v7 = vsub.f32 %v199_v5, %v202_v6  ;;  %v198_v13 = vsub.f32 %v193_v8, %v196_v10 }
  0x90   : > { %v975_v9 = vmul.f32 3.1415927, %v972_v7  ;;  %v206_v19 = vmul.f32 %v198_v13, %v198_v13  ;;  %v208_v26 = vmul.f32 %v972_v7, %v972_v7 }
  0x92   : > { %v219_v11 = vand.u32 2139095040, %v975_v9  ;;  %v216_v12 = vand.u32 2147483647, %v975_v9  ;;  %vm218_vm12 = vcmp.lt.s32.totalorder %v975_v9, 0 }
  0x94   : > { %v220_v15 = vshrl.u32 %v219_v11, 23  ;;  %v223_v18 = vand.u32 8388607, %v216_v12  ;;  %vm217_vm13 = vcmp.le.f32.partialorder %v216_v12, 0.7853982 }
  0x96   : > { %v665_v16 = vadd.s32 4294967169, %v220_v15  ;;  %v190_v17 = vpop.permute.xlu0 %189  ;;  %v224_v23 = vor.u32 8388608, %v223_v18 }
  0x97   : > { %v192_v20 = vsub.f32 %v186_v14, %v190_v17 }
  0x98   : > { %v226_v21 = vadd.s32 1, %v665_v16  ;;  %v988_v35 = vshll.u32 %v224_v23, 8 }
  0x99   : > { %v205_v22 = vmul.f32 %v192_v20, %v192_v20 }
  0x9a   : > { %vm227_vm0 = vcmp.gt.s32.totalorder %v226_v21, 0  ;;  %v265_v61 = vand.u32 65535, %v988_v35  ;;  %v266_v0 = vshrl.u32 %v988_v35, 16 }
  0x9b   : > { %v228_v24 = vsel %vm227_vm0, %v226_v21, 0  ;;  %v207_v25 = vadd.f32 %v206_v19, %v205_v22 }
  0x9c   : > { %v230_v27 = vand.u32 31, %v228_v24  ;;  %v985_v30 = vshrl.u32 %v228_v24, 5 }
  0x9d   : > { %v209_v29 = vadd.f32 %v208_v26, %v207_v25 }
  0x9e   : > { %v983_v28 = vsub.s32 32, %v230_v27  ;;  %v233_v32 = vshll.u32 %v866_v31, %v230_v27  ;;  %v236_v34 = vshll.u32 %v867_v33, %v230_v27  ;;  %v239_v39 = vshll.u32 %v868_v37, %v230_v27 }
  0x9f   : > { %v242_v42 = vshll.u32 %v869_v40, %v230_v27  ;;  %v245_v45 = vshll.u32 %v870_v43, %v230_v27  ;;  %v210_v51 = vmul.f32 -50.0, %v209_v29  ;;  %vm248_vm1 = vcmp.lt.s32.totalorder %v985_v30, 1 }
  0xa0   : > { %v234_v36 = vshrl.u32 %v867_v33, %v983_v28  ;;  %v237_v38 = vshrl.u32 %v868_v37, %v983_v28  ;;  %v240_v41 = vshrl.u32 %v869_v40, %v983_v28  ;;  %v243_v44 = vshrl.u32 %v870_v43, %v983_v28 }
  0xa1   : > { %v246_v47 = vshrl.u32 %v871_v46, %v983_v28  ;;  %vm250_vm2 = vcmp.lt.s32.totalorder %v985_v30, 3  ;;  %vm251_vm3 = vcmp.lt.s32.totalorder %v985_v30, 4  ;;  %v211_v58 = vmul.f32 1.442695, %v210_v51 }
  0xa2   : > { %v995_v48 = vor.u32 %v234_v36, %v233_v32  ;;  %v997_v49 = vor.u32 %v237_v38, %v236_v34  ;;  %v241_v50 = vor.u32 %v240_v41, %v239_v39  ;;  %v244_v52 = vor.u32 %v243_v44, %v242_v42 }
  0xa3   : > { %v247_v53 = vor.u32 %v246_v47, %v245_v45  ;;  %vm249_vm4 = vcmp.lt.s32.totalorder %v985_v30, 2  ;;  %765 = vpow2.f32 %v211_v58 }
  0xa4   : > { %v256_v54 = vsel %vm248_vm1, %v995_v48, %v997_v49  ;;  %v260_v55 = vsel %vm248_vm1, %v997_v49, %v241_v50  ;;  %v257_v56 = vsel %vm251_vm3, %v244_v52, 920167782  ;;  %v253_v29 = vsel %vm251_vm3, %v241_v50, 2102212464 }
  0xa5   : > { %v261_v57 = vsel %vm251_vm3, %v247_v53, 1326507024  ;;  %v258_v59 = vsel %vm250_vm2, %v241_v50, %v257_v56  ;;  %v254_v41 = vsel %vm250_vm2, %v997_v49, %v253_v29 }
  0xa6   : > { %v262_v60 = vsel %vm250_vm2, %v244_v52, %v261_v57  ;;  %v259_v62 = vsel %vm249_vm4, %v256_v54, %v258_v59 }
  0xa7   : > { %v263_v63 = vsel %vm249_vm4, %v260_v55, %v262_v60  ;;  %v289_v4 = vand.u32 65535, %v259_v62  ;;  %v290_v5 = vshrl.u32 %v259_v62, 16 }
  0xa8   : > { %v267_v1 = vand.u32 65535, %v263_v63  ;;  %v268_v2 = vshrl.u32 %v263_v63, 16 }
  0xa9   : > { %v292_v10 = vmul.u32 %v290_v5, %v265_v61  ;;  %v293_v11 = vmul.u32 %v289_v4, %v266_v0  ;;  %v1027_v15 = vpop.eup %765  ;;  %v291_v17 = vmul.u32 %v289_v4, %v265_v61  ;;  %v294_v18 = vmul.u32 %v290_v5, %v266_v0 }
  0xaa   : > { %v270_v6 = vmul.u32 %v268_v2, %v265_v61  ;;  %v271_v8 = vmul.u32 %v267_v1, %v266_v0  ;;  %v269_v13 = vmul.u32 %v267_v1, %v265_v61  ;;  %v272_v16 = vmul.u32 %v268_v2, %v266_v0 }
  0xab   : > { %v295_v19 = vshll.u32 %v292_v10, 16  ;;  %v213_v22 = vmul.f32 %v1027_v15, %v972_v7  ;;  %v297_v24 = vshll.u32 %v293_v11, 16  ;;  %v232_v7 = vshrl.u32 %v866_v31, %v983_v28 }
  0xac   : > { %v273_v14 = vshll.u32 %v270_v6, 16  ;;  %v275_v20 = vshll.u32 %v271_v8, 16  ;;  %v274_v34 = vshrl.u32 %v270_v6, 16  ;;  %v296_v38 = vshrl.u32 %v292_v10, 16 }
  0xad   : > { %vm299_vm6 = vc.u32 %v291_v17, %v295_v19  ;;  %v301_v25 = vadd.s32 %v295_v19, %v291_v17  ;;  %214 = vst [vmem:[%s1033_s26] sm:$0xff] %v213_v22  ;;  %v252_v40 = vsel %vm248_vm1, %v232_v7, %v995_v48  ;;  %v276_v42 = vshrl.u32 %v271_v8, 16 }
  0xae   : > { %vm277_vm5 = vc.u32 %v269_v13, %v273_v14  ;;  %v279_v21 = vadd.s32 %v273_v14, %v269_v13  ;;  %v300_v27 = vsel %vm299_vm6, 1, %v865_v3  ;;  %v298_v44 = vshrl.u32 %v293_v11, 16 }
  0xaf   : > { %v278_v23 = vsel %vm277_vm5, 1, %v865_v3  ;;  %v302_v33 = vadd.s32 %v300_v27, %v294_v18  ;;  %vm303_vm8 = vc.u32 %v301_v25, %v297_v24  ;;  %v305_v28 = vadd.s32 %v301_v25, %v297_v24 }
  0xb0   : > { %v280_v26 = vadd.s32 %v278_v23, %v272_v16  ;;  %vm281_vm7 = vc.u32 %v279_v21, %v275_v20  ;;  %v304_v37 = vsel %vm303_vm8, 1, %v865_v3  ;;  %v255_v31 = vsel %vm249_vm4, %v252_v40, %v254_v41 }
  0xb1   : > { %v282_v32 = vsel %vm281_vm7, 1, %v865_v3  ;;  %v306_v39 = vadd.s32 %v304_v37, %v302_v33  ;;  %v309_v50 = vmul.u32 %v988_v35, %v255_v31  ;;  %vm359_vm4 = vweird.f32 %v975_v9 }
  0xb2   : > { %v284_v36 = vadd.s32 %v282_v32, %v280_v26 }
  0xb3   : > { %v307_v45 = vadd.s32 %v306_v39, %v296_v38 }
  0xb4   : > { %v285_v43 = vadd.s32 %v284_v36, %v274_v34 }
  0xb5   : > { %v308_v3 = vadd.s32 %v307_v45, %v298_v44 }
  0xb6   : > { %v286_v46 = vadd.s32 %v285_v43, %v276_v42 }
  0xb7   : > { %v312_v47 = vadd.s32 1, %v308_v3 }
  0xb8   : > { %vm311_vm9 = vc.u32 %v286_v46, %v305_v28  ;;  %v310_v30 = vadd.s32 %v305_v28, %v286_v46 }
  0xb9   : > { %v313_v51 = vsel %vm311_vm9, %v312_v47, %v308_v3 }
  0xba   : > { %v314_v48 = vadd.s32 %v313_v51, %v309_v50 }
  0xbc   : > { %v315_v52 = vadd.s32 536870912, %v314_v48 }
  0xbe   : > { %v316_v53 = vshrl.u32 %v315_v52, 30 }
  0xc0   : > { %v317_v54 = vshll.u32 %v316_v53, 30  ;;  %v340_v11 = vsub.s32 4, %v316_v53 }
  0xc2   : > { %v318_v49 = vsub.s32 %v314_v48, %v317_v54  ;;  %v341_v18 = vsel %vm218_vm12, %v340_v11, %v316_v53 }
  0xc3   : > { %v343_v21 = vsel %vm217_vm13, 0, %v341_v18 }
  0xc4   : > { %vm319_vm10 = vcmp.lt.s32.totalorder %v318_v49, 0  ;;  %v320_v55 = vsub.s32 0, %v318_v49  ;;  %v360_v26 = vadd.s32 3, %v343_v21  ;;  %v515_v33 = vand.u32 3, %v343_v21 }
  0xc6   : > { %v321_v56 = vsel %vm319_vm10, %v320_v55, %v318_v49  ;;  %v361_v7 = vand.u32 3, %v360_v26  ;;  %vm516_vm14 = vcmp.lt.s32.totalorder %v515_v33, 2  ;;  %vm517_vm15 = vcmp.eq.s32.totalorder %v515_v33, 0 }
  0xc7   : > { %v322_v57 = vclz %v321_v56  ;;  %vm520_vm3 = vcmp.eq.s32.totalorder %v515_v33, 2 }
  0xc8   : > { %vm362_vm0 = vcmp.lt.s32.totalorder %v361_v7, 2  ;;  %vm363_vm1 = vcmp.eq.s32.totalorder %v361_v7, 0  ;;  %vm366_vm2 = vcmp.eq.s32.totalorder %v361_v7, 2 }
  0xc9   : > { %v666_v58 = vadd.s32 4294967294, %v322_v57 }
  0xcb   : > { %vm667_vm11 = vcmp.lt.s32.totalorder %v666_v58, 0 }
  0xcc   : > { %v325_v59 = vsel %vm667_vm11, 0, %v666_v58 }
  0xcd   : > { %v326_v60 = vsub.s32 32, %v325_v59  ;;  %v330_v61 = vsub.s32 4294967266, %v325_v59  ;;  %v327_v62 = vshll.u32 %v318_v49, %v325_v59 }
  0xcf   : > { %v328_v63 = vshrl.u32 %v310_v30, %v326_v60  ;;  %v331_v0 = vadd.s32 127, %v330_v61 }
  0xd1   : > { %v329_v35 = vor.u32 %v328_v63, %v327_v62  ;;  %v332_v1 = vshll.u32 %v331_v0, 23 }
  0xd3   : > { %v333_v2 = vor.u32 4788187, %v332_v1  ;;  %v336_v5 = vcvt.s32.f32 %v329_v35 }
  0xd5   : > { %v334_v4 = vand.u32 2147483647, %v333_v2 }
  0xd7   : > { %v337_v6 = vmul.f32 %v336_v5, %v334_v4 }
  0xd9   : > { %v338_v8 = vxor.u32 2147483648, %v337_v6 }
  0xdb   : > { %v339_v10 = vsel %vm218_vm12, %v338_v8, %v337_v6 }
  0xdc   : > { %v342_v13 = vsel %vm217_vm13, %v975_v9, %v339_v10 }
  0xdd   : > { %v344_v14 = vmul.f32 %v342_v13, %v342_v13 }
  0xdf   : > { %v345_v16 = vmul.f32 -0.001358992, %v344_v14  ;;  %v352_v17 = vmul.f32 -0.00019511016, %v344_v14 }
  0xe1   : > { %v346_v19 = vadd.f32 0.041655596, %v345_v16  ;;  %v353_v20 = vadd.f32 0.008332121, %v352_v17 }
  0xe3   : > { %v347_v22 = vmul.f32 %v346_v19, %v344_v14  ;;  %v354_v23 = vmul.f32 %v353_v20, %v344_v14 }
  0xe5   : > { %v348_v24 = vadd.f32 -0.4999988, %v347_v22  ;;  %v355_v25 = vadd.f32 -0.16666654, %v354_v23 }
  0xe7   : > { %v349_v27 = vmul.f32 %v348_v24, %v344_v14  ;;  %v356_v29 = vmul.f32 %v355_v25, %v344_v14 }
  0xe9   : > { %v350_v12 = vadd.f32 1.0, %v349_v27  ;;  %v357_v32 = vadd.f32 1.0, %v356_v29 }
  0xeb   : > { %v358_v34 = vmul.f32 %v357_v32, %v342_v13  ;;  %v367_v36 = vxor.u32 2147483648, %v350_v12 }
  0xed   : > { %v364_v37 = vxor.u32 2147483648, %v358_v34  ;;  %v368_v39 = vsel %vm366_vm2, %v367_v36, %v358_v34  ;;  %v522_v41 = vsel %vm520_vm3, %v367_v36, %v358_v34 }
  0xef   : > { %v365_v38 = vsel %vm363_vm1, %v350_v12, %v364_v37  ;;  %v519_v40 = vsel %vm517_vm15, %v350_v12, %v364_v37 }
  0xf0   : > { %v369_v42 = vsel %vm362_vm0, %v365_v38, %v368_v39  ;;  %v523_v43 = vsel %vm516_vm14, %v519_v40, %v522_v41 }
  0xf1   : > { %v370_v44 = vsel %vm359_vm4, nan, %v369_v42  ;;  %v524_v45 = vsel %vm359_vm4, nan, %v523_v43 }
  0xf2   : > { %v529_v46 = vmul.f32 2.0, %v370_v44  ;;  %v531_v28 = vmul.f32 2.0, %v524_v45  ;;  %v525_v31 = vmul.f32 %v1027_v15, %v370_v44  ;;  %v527_v3 = vmul.f32 %v1027_v15, %v524_v45 }
  0xf4   : > { %v530_v47 = vmul.f32 %v529_v46, %v524_v45  ;;  %v532_v50 = vmul.f32 %v531_v28, %v524_v45  ;;  %526 = vst [vmem:[%s1033_s26 + $0x8] sm:$0xff] %v525_v31 }
  0xf5   : > { %528 = vst [vmem:[%s1033_s26 + $0x10] sm:$0xff] %v527_v3 }
  0xf6   : > { %v671_v9 = vadd.f32 -1.0, %v532_v50  ;;  %v538_v51 = vmul.f32 2.0, %v530_v47  ;;  %v534_v48 = vmul.f32 %v1027_v15, %v530_v47 }
  0xf8   : > { %v539_v52 = vmul.f32 %v671_v9, %v538_v51  ;;  %v540_v53 = vmul.f32 2.0, %v671_v9  ;;  %535 = vst [vmem:[%s1033_s26 + $0x18] sm:$0xff] %v534_v48  ;;  %v536_v54 = vmul.f32 %v1027_v15, %v671_v9 }
  0xfa   : > { %v541_v49 = vmul.f32 %v671_v9, %v540_v53  ;;  %537 = vst [vmem:[%s1033_s26 + $0x20] sm:$0xff] %v536_v54  ;;  %v543_v55 = vmul.f32 %v1027_v15, %v539_v52 }
  0xfc   : > { %v672_v56 = vadd.f32 -1.0, %v541_v49  ;;  %544 = vst [vmem:[%s1033_s26 + $0x28] sm:$0xff] %v543_v55 }
  0xfe   : > { %v545_v57 = vmul.f32 %v1027_v15, %v672_v56 }
 0x100   : > { %546 = vst [vmem:[%s1033_s26 + $0x30] sm:$0xff] %v545_v57 }
 0x101   : > { %794 = shalt.err (!%p791_p7)
}
 0x102   : > { %s872_s24 = smov 128   ;;  %s873_s26 = smov 256  }
 0x103   : > { %s874_s29 = smov 8  }
 0x104   : > { %678 = dma.vmem_to_hbm [thread:$0]  (%p941_p3), %s562_s4, 896, %s564_s5, %s548_s6, %s872_s24, %s873_s26, %s874_s29  }
 0x105 PF: > { %p684_p9 = scmp.ge.s32.totalorder %s861_s16, 2  ;;  %s578_s13 = sand.u32 1, %s833_s9  }
 0x106   : > { %s579_s12 = scalar_lea.sflag [#allocation3], %s578_s13 }
 0x107   : > { %p681_p10 = pnand %p684_p9, %p950_p8 }
 0x109   : > { %p682_p11 = pneg %p681_p10 }
 0x10b   : > { %828 = dma.done.wait (%p682_p11), %s579_s12, 896  }
 0x10c   : > { %830 = vsyncadd (%p682_p11), %s579_s12, 4294966400  ;;  %s15_s16 = sadd.s32 1, %s861_s16   ;;  %s1119_s9 = smov %s837_s10 }
 0x10d   : > { %p12_p12 = scmp.ge.s32.totalorder %s15_s16, 6   ;;  %s1120_s10 = smov %s841_s11 }
 0x10e   : > { %s1121_s11 = smov %s959_s27  ;;  %s1122_s12 = smov %s853_s14 }
 0x10f   : > { %s1123_s13 = smov %s857_s15  ;;  %s1124_s14 = smov %s1127_s19 }
 0x110   : > { %s1125_s15 = smov %s1131_s20  ;;  %14 = sbr.rel (!%p12_p12) target bundleno = 5 (0x5), region = 66 }
 0x115   :  { %585 = vsyncpa [#allocation3], 1 }
 0x116   :  { %587 = vsyncpa [#allocation3 + $0x1], 1 }

</bundles_post_ra>
